<compile_context>
chip_gen: v7x
topology: tpu7x:2x2x1
jax: 0.10.0
libtpu: 0.0.40
codegen_flags: <defaults>
</compile_context>

<pallas_src>
import functools

import jax
import jax.numpy as jnp
from jax.experimental import pallas as pl
from jax.experimental.pallas import tpu as pltpu


# -----------------------------------------------------------------------------
# Pallas kernel: one (channels, tile_v) slab of voxels; voxels on the lane axis.
# -----------------------------------------------------------------------------
def _attention_gate_kernel(g_ref, x_ref, wgt_ref, wxt_ref, b_ref, wp_ref,
                           bp_ref, o_ref):
    # g_ref:   (F_g,  TV)   x_ref: (F_l, TV)
    # wgt_ref: (F_int, F_g) wxt_ref: (F_int, F_l)   (BN-folded, pre-transposed)
    # b_ref:   (F_int, 1)   == folded (b_g + b_x)
    # wp_ref:  (F_int, 1)   bp_ref: (1, 1)
    g1 = jnp.dot(wgt_ref[...], g_ref[...], preferred_element_type=jnp.float32)
    x1 = jnp.dot(wxt_ref[...], x_ref[...], preferred_element_type=jnp.float32)
    a = jnp.maximum(g1 + x1 + b_ref[...], 0.0)                  # (F_int, TV)
    # psi has a single output channel: use a VPU multiply + sublane reduction
    # instead of a 1-column MXU matmul (MXU result FIFO is wasted otherwise).
    p = jnp.sum(a * wp_ref[...], axis=0, keepdims=True) + bp_ref[...]  # (1, TV)
    p = jax.nn.sigmoid(p)
    o_ref[...] = (x_ref[...] * p).astype(o_ref.dtype)           # lane-dense store


# -----------------------------------------------------------------------------
# Wrapper: BN folding, layout plumbing, pallas_call.
# -----------------------------------------------------------------------------
def _fold_bn(w, b, gamma, beta, mean, var, eps=1e-5):
    """Fold eval-mode BatchNorm into a 1x1x1 conv. w: (Cin, Cout), b: (Cout,)."""
    scale = gamma / jnp.sqrt(var + eps)
    w_eff = w * scale[None, :]
    b_eff = (b - mean) * scale + beta
    return w_eff, b_eff


def _round_up(x, m):
    return ((x + m - 1) // m) * m


@functools.partial(jax.jit, static_argnames=("tile_v",))
def attention_block_pallas(g, x, params, tile_v=1024):
    """g: (N, F_g, D, H, W), x: (N, F_l, D, H, W)  ->  (N, F_l, D, H, W)."""
    N, F_g, D, H, W = g.shape
    F_l = x.shape[1]
    V = D * H * W

    wg, bg = _fold_bn(params["wg"], params["bg"], params["bn_g_gamma"],
                      params["bn_g_beta"], params["bn_g_mean"], params["bn_g_var"])
    wx, bx = _fold_bn(params["wx"], params["bx"], params["bn_x_gamma"],
                      params["bn_x_beta"], params["bn_x_mean"], params["bn_x_var"])
    wp, bp = _fold_bn(params["wp"], params["bp"], params["bn_p_gamma"],
                      params["bn_p_beta"], params["bn_p_mean"], params["bn_p_var"])
    F_int = wg.shape[1]

    # Channels-major layout: (N, C, V), voxels on the lane axis.  Pure reshape,
    # no transpose -> no extra HBM round trips in the XLA wrapper.
    g_cv = g.reshape(N, F_g, V)
    x_cv = x.reshape(N, F_l, V)

    # Lane tile: multiple of 128, not larger than needed.
    tile = min(_round_up(max(tile_v, 128), 128), _round_up(V, 128))
    V_pad = _round_up(V, tile)
    if V_pad != V:  # only when the voxel count is not tile-friendly
        pad = ((0, 0), (0, 0), (0, V_pad - V))
        g_cv = jnp.pad(g_cv, pad)
        x_cv = jnp.pad(x_cv, pad)

    # Tiny weights: transpose once at fold time, merge the two F_int biases.
    wgT = wg.T                               # (F_int, F_g)
    wxT = wx.T                               # (F_int, F_l)
    b_sum = (bg + bx).reshape(F_int, 1)      # (F_int, 1)
    wp2 = wp.reshape(F_int, 1)
    bp2 = bp.reshape(1, 1)

    grid = (N, V_pad // tile)

    # VMEM budget: double-buffered g/x/out tiles + f32 intermediates + weights.
    itemsize = 4
    io_bytes = tile * (F_g + 2 * F_l) * itemsize
    interm_bytes = tile * (3 * F_int + 2) * itemsize
    w_bytes = (F_int * (F_g + F_l + 2) + 1) * itemsize
    needed = 2 * io_bytes + interm_bytes + 2 * w_bytes
    vmem_limit = int(min(max(2 * needed, 32 * 1024 * 1024), 64 * 1024 * 1024))

    full = lambda n, v: (0, 0)  # grid-invariant parameter tiles

    out_cv = pl.pallas_call(
        _attention_gate_kernel,
        out_shape=jax.ShapeDtypeStruct((N, F_l, V_pad), x.dtype),
        grid_spec=pltpu.PrefetchScalarGridSpec(
            num_scalar_prefetch=0,
            grid=grid,
            in_specs=[
                pl.BlockSpec((None, F_g, tile), lambda n, v: (n, 0, v)),  # g
                pl.BlockSpec((None, F_l, tile), lambda n, v: (n, 0, v)),  # x
                pl.BlockSpec((F_int, F_g), full),                         # Wg^T
                pl.BlockSpec((F_int, F_l), full),                         # Wx^T
                pl.BlockSpec((F_int, 1), full),                           # bg+bx
                pl.BlockSpec((F_int, 1), full),                           # w_psi
                pl.BlockSpec((1, 1), full),                               # b_psi
            ],
            out_specs=pl.BlockSpec((None, F_l, tile), lambda n, v: (n, 0, v)),
        ),
        compiler_params=pltpu.CompilerParams(
            dimension_semantics=("parallel", "parallel"),
            vmem_limit_bytes=vmem_limit),
    )(g_cv, x_cv, wgT, wxT, b_sum, wp2, bp2)

    if V_pad != V:
        out_cv = out_cv[:, :, :V]
    return out_cv.reshape(N, F_l, D, H, W)


# -----------------------------------------------------------------------------
# Pure-JAX reference (same folded-BN semantics) for a correctness check.
# -----------------------------------------------------------------------------
def attention_block_ref(g, x, params):
    wg, bg = _fold_bn(params["wg"], params["bg"], params["bn_g_gamma"],
                      params["bn_g_beta"], params["bn_g_mean"], params["bn_g_var"])
    wx, bx = _fold_bn(params["wx"], params["bx"], params["bn_x_gamma"],
                      params["bn_x_beta"], params["bn_x_mean"], params["bn_x_var"])
    wp, bp = _fold_bn(params["wp"], params["bp"], params["bn_p_gamma"],
                      params["bn_p_beta"], params["bn_p_mean"], params["bn_p_var"])
    g_ = jnp.transpose(g, (0, 2, 3, 4, 1))  # N D H W C
    x_ = jnp.transpose(x, (0, 2, 3, 4, 1))
    g1 = jnp.einsum("ndhwc,ce->ndhwe", g_, wg) + bg
    x1 = jnp.einsum("ndhwc,ce->ndhwe", x_, wx) + bx
    a = jnp.maximum(g1 + x1, 0.0)
    p = jax.nn.sigmoid(jnp.einsum("ndhwe,eo->ndhwo", a, wp) + bp)
    out = x_ * p
    return jnp.transpose(out, (0, 4, 1, 2, 3))


def make_params(key, F_g, F_l, F_int):
    ks = jax.random.split(key, 12)
    p = {
        "wg": jax.random.normal(ks[0], (F_g, F_int), jnp.float32) * 0.2,
        "bg": jax.random.normal(ks[1], (F_int,), jnp.float32) * 0.1,
        "wx": jax.random.normal(ks[2], (F_l, F_int), jnp.float32) * 0.2,
        "bx": jax.random.normal(ks[3], (F_int,), jnp.float32) * 0.1,
        "wp": jax.random.normal(ks[4], (F_int, 1), jnp.float32) * 0.2,
        "bp": jax.random.normal(ks[5], (1,), jnp.float32) * 0.1,
        # BatchNorm params / running stats (deterministic, nontrivial).
        "bn_g_gamma": 1.0 + 0.1 * jax.random.normal(ks[6], (F_int,), jnp.float32),
        "bn_g_beta": 0.05 * jax.random.normal(ks[7], (F_int,), jnp.float32),
        "bn_g_mean": jnp.zeros((F_int,), jnp.float32),
        "bn_g_var": jnp.ones((F_int,), jnp.float32),
        "bn_x_gamma": 1.0 + 0.1 * jax.random.normal(ks[8], (F_int,), jnp.float32),
        "bn_x_beta": 0.05 * jax.random.normal(ks[9], (F_int,), jnp.float32),
        "bn_x_mean": jnp.zeros((F_int,), jnp.float32),
        "bn_x_var": jnp.ones((F_int,), jnp.float32),
        "bn_p_gamma": 1.0 + 0.1 * jax.random.normal(ks[10], (1,), jnp.float32),
        "bn_p_beta": 0.05 * jax.random.normal(ks[11], (1,), jnp.float32),
        "bn_p_mean": jnp.zeros((1,), jnp.float32),
        "bn_p_var": jnp.ones((1,), jnp.float32),
    }
    return p


if __name__ == "__main__":
    key = jax.random.PRNGKey(0)
    k_g, k_x, k_p = jax.random.split(key, 3)

    # Small shapes: N=2, F_g=F_l=4, F_int=8, D=H=W=4  (64 voxels per batch item).
    N, F_g, F_l, F_int, D, H, W = 2, 4, 4, 8, 4, 4, 4
    g = jax.random.normal(k_g, (N, F_g, D, H, W), jnp.float32)
    x = jax.random.normal(k_x, (N, F_l, D, H, W), jnp.float32)
    params = make_params(k_p, F_g, F_l, F_int)

    out = attention_block_pallas(g, x, params)
    out = jax.block_until_ready(out)

    ref = attention_block_ref(g, x, params)
    assert out.shape == (N, F_l, D, H, W)
    assert jnp.allclose(out, ref, atol=1e-5, rtol=1e-5), "mismatch vs JAX reference"

    print("KERNEL_OK")
</pallas_src>

<mosaic_0001>
module attributes {stable_mosaic.version = 11 : i64} {
  func.func @_attention_gate_kernel(%arg0: i32, %arg1: i32, %arg2: memref<1x4x128xf32, #tpu.memory_space<vmem>>, %arg3: memref<1x4x128xf32, #tpu.memory_space<vmem>>, %arg4: memref<8x4xf32, #tpu.memory_space<vmem>>, %arg5: memref<8x4xf32, #tpu.memory_space<vmem>>, %arg6: memref<8x1xf32, #tpu.memory_space<vmem>>, %arg7: memref<8x1xf32, #tpu.memory_space<vmem>>, %arg8: memref<1x1xf32, #tpu.memory_space<vmem>>, %arg9: memref<1x4x128xf32, #tpu.memory_space<vmem>>) attributes {dimension_semantics = [#tpu.dimension_semantics<parallel>, #tpu.dimension_semantics<parallel>], iteration_bounds = array<i64: 2, 1>, scalar_prefetch = 0 : i64, scratch_operands = 0 : i64, tpu.core_type = #tpu.core_type<tc>, window_params = [{transform_indices = @transform_0, window_bounds = array<i64: 1, 4, 128>}, {transform_indices = @transform_1, window_bounds = array<i64: 1, 4, 128>}, {pipeline_mode = #tpu.pipeline_mode<synchronous>, transform_indices = @transform_2, window_bounds = array<i64: 8, 4>}, {pipeline_mode = #tpu.pipeline_mode<synchronous>, transform_indices = @transform_3, window_bounds = array<i64: 8, 4>}, {pipeline_mode = #tpu.pipeline_mode<synchronous>, transform_indices = @transform_4, window_bounds = array<i64: 8, 1>}, {pipeline_mode = #tpu.pipeline_mode<synchronous>, transform_indices = @transform_5, window_bounds = array<i64: 8, 1>}, {pipeline_mode = #tpu.pipeline_mode<synchronous>, transform_indices = @transform_6, window_bounds = array<i64: 1, 1>}, {transform_indices = @transform_7, window_bounds = array<i64: 1, 4, 128>}]} {
    %c0 = arith.constant 0 : index
    %c0_0 = arith.constant 0 : index
    %0 = vector.load %arg4[%c0, %c0_0] : memref<8x4xf32, #tpu.memory_space<vmem>>, vector<8x4xf32>
    %c0_1 = arith.constant 0 : index
    %c0_2 = arith.constant 0 : index
    %c0_3 = arith.constant 0 : index
    %1 = vector.load %arg2[%c0_1, %c0_2, %c0_3] : memref<1x4x128xf32, #tpu.memory_space<vmem>>, vector<1x4x128xf32>
    %2 = vector.shape_cast %1 : vector<1x4x128xf32> to vector<4x128xf32>
    %cst = arith.constant dense<0.000000e+00> : vector<8x128xf32>
    %3 = tpu.matmul %0, %2, %cst {dimension_numbers = #tpu.dot_dimension_numbers<[1], [0], [0], [1], [0, 0, 1, 1], [], []>} : vector<8x4xf32>, vector<4x128xf32>, vector<8x128xf32> -> vector<8x128xf32>
    %c0_4 = arith.constant 0 : index
    %c0_5 = arith.constant 0 : index
    %4 = vector.load %arg5[%c0_4, %c0_5] : memref<8x4xf32, #tpu.memory_space<vmem>>, vector<8x4xf32>
    %c0_6 = arith.constant 0 : index
    %c0_7 = arith.constant 0 : index
    %c0_8 = arith.constant 0 : index
    %5 = vector.load %arg3[%c0_6, %c0_7, %c0_8] : memref<1x4x128xf32, #tpu.memory_space<vmem>>, vector<1x4x128xf32>
    %6 = vector.shape_cast %5 : vector<1x4x128xf32> to vector<4x128xf32>
    %cst_9 = arith.constant dense<0.000000e+00> : vector<8x128xf32>
    %7 = tpu.matmul %4, %6, %cst_9 {dimension_numbers = #tpu.dot_dimension_numbers<[1], [0], [0], [1], [0, 0, 1, 1], [], []>} : vector<8x4xf32>, vector<4x128xf32>, vector<8x128xf32> -> vector<8x128xf32>
    %8 = arith.addf %3, %7 : vector<8x128xf32>
    %c0_10 = arith.constant 0 : index
    %c0_11 = arith.constant 0 : index
    %9 = vector.load %arg6[%c0_10, %c0_11] : memref<8x1xf32, #tpu.memory_space<vmem>>, vector<8x1xf32>
    %10 = vector.broadcast %9 : vector<8x1xf32> to vector<8x128xf32>
    %11 = arith.addf %8, %10 : vector<8x128xf32>
    %cst_12 = arith.constant 0.000000e+00 : f32
    %12 = vector.broadcast %cst_12 : f32 to vector<8x128xf32>
    %13 = arith.maximumf %11, %12 : vector<8x128xf32>
    %c0_13 = arith.constant 0 : index
    %c0_14 = arith.constant 0 : index
    %14 = vector.load %arg7[%c0_13, %c0_14] : memref<8x1xf32, #tpu.memory_space<vmem>>, vector<8x1xf32>
    %15 = vector.broadcast %14 : vector<8x1xf32> to vector<8x128xf32>
    %16 = arith.mulf %13, %15 : vector<8x128xf32>
    %cst_15 = arith.constant dense<0.000000e+00> : vector<128xf32>
    %17 = vector.multi_reduction <add>, %16, %cst_15 [0] : vector<8x128xf32> to vector<128xf32>
    %18 = vector.shape_cast %17 : vector<128xf32> to vector<1x128xf32>
    %c0_16 = arith.constant 0 : index
    %c0_17 = arith.constant 0 : index
    %19 = vector.load %arg8[%c0_16, %c0_17] : memref<1x1xf32, #tpu.memory_space<vmem>>, vector<1x1xf32>
    %20 = vector.broadcast %19 : vector<1x1xf32> to vector<1x128xf32>
    %21 = arith.addf %18, %20 : vector<1x128xf32>
    %22 = arith.negf %21 : vector<1x128xf32>
    %23 = math.exp %22 : vector<1x128xf32>
    %cst_18 = arith.constant 1.000000e+00 : f32
    %24 = vector.broadcast %cst_18 : f32 to vector<1x128xf32>
    %25 = arith.addf %24, %23 : vector<1x128xf32>
    %26 = arith.divf %24, %25 : vector<1x128xf32>
    %c0_19 = arith.constant 0 : index
    %c0_20 = arith.constant 0 : index
    %c0_21 = arith.constant 0 : index
    %27 = vector.load %arg3[%c0_19, %c0_20, %c0_21] : memref<1x4x128xf32, #tpu.memory_space<vmem>>, vector<1x4x128xf32>
    %28 = vector.shape_cast %27 : vector<1x4x128xf32> to vector<4x128xf32>
    %29 = vector.broadcast %26 : vector<1x128xf32> to vector<4x128xf32>
    %30 = arith.mulf %28, %29 : vector<4x128xf32>
    %c0_22 = arith.constant 0 : index
    %c0_23 = arith.constant 0 : index
    %c0_24 = arith.constant 0 : index
    %31 = vector.load %arg9[%c0_22, %c0_23, %c0_24] : memref<1x4x128xf32, #tpu.memory_space<vmem>>, vector<1x4x128xf32>
    %32 = vector.shape_cast %31 : vector<1x4x128xf32> to vector<4x128xf32>
    %33 = vector.shape_cast %30 : vector<4x128xf32> to vector<1x4x128xf32>
    tpu.vector_store %arg9[%c0_22, %c0_23, %c0_24], %33 {strides = array<i32>} : memref<1x4x128xf32, #tpu.memory_space<vmem>>, vector<1x4x128xf32>,
    return
  }
  func.func @transform_0(%arg0: i32, %arg1: i32) -> (i32, i32, i32) {
    %c0_i32 = arith.constant 0 : i32
    %c0_i32_0 = arith.constant 0 : i32
    return %arg0, %c0_i32, %arg1 : i32, i32, i32
  }
  func.func @transform_1(%arg0: i32, %arg1: i32) -> (i32, i32, i32) {
    %c0_i32 = arith.constant 0 : i32
    %c0_i32_0 = arith.constant 0 : i32
    return %arg0, %c0_i32, %arg1 : i32, i32, i32
  }
  func.func @transform_2(%arg0: i32, %arg1: i32) -> (i32, i32) {
    %c0_i32 = arith.constant 0 : i32
    %c0_i32_0 = arith.constant 0 : i32
    %c0_i32_1 = arith.constant 0 : i32
    return %c0_i32, %c0_i32_0 : i32, i32
  }
  func.func @transform_3(%arg0: i32, %arg1: i32) -> (i32, i32) {
    %c0_i32 = arith.constant 0 : i32
    %c0_i32_0 = arith.constant 0 : i32
    %c0_i32_1 = arith.constant 0 : i32
    return %c0_i32, %c0_i32_0 : i32, i32
  }
  func.func @transform_4(%arg0: i32, %arg1: i32) -> (i32, i32) {
    %c0_i32 = arith.constant 0 : i32
    %c0_i32_0 = arith.constant 0 : i32
    %c0_i32_1 = arith.constant 0 : i32
    return %c0_i32, %c0_i32_0 : i32, i32
  }
  func.func @transform_5(%arg0: i32, %arg1: i32) -> (i32, i32) {
    %c0_i32 = arith.constant 0 : i32
    %c0_i32_0 = arith.constant 0 : i32
    %c0_i32_1 = arith.constant 0 : i32
    return %c0_i32, %c0_i32_0 : i32, i32
  }
  func.func @transform_6(%arg0: i32, %arg1: i32) -> (i32, i32) {
    %c0_i32 = arith.constant 0 : i32
    %c0_i32_0 = arith.constant 0 : i32
    %c0_i32_1 = arith.constant 0 : i32
    return %c0_i32, %c0_i32_0 : i32, i32
  }
  func.func @transform_7(%arg0: i32, %arg1: i32) -> (i32, i32, i32) {
    %c0_i32 = arith.constant 0 : i32
    %c0_i32_0 = arith.constant 0 : i32
    return %arg0, %c0_i32, %arg1 : i32, i32, i32
  }
}

</mosaic_0001>

<bundles_post_ra>
// kernel: attention_block_pallas.1
= control target key start
LH: loop header
LB: loop body
LE: loop exit
PB: predicated region body
PF: predicated region fallthrough
CT: control target
= control target key end

     0   :  { %s754_s26 = smov 0   ;;  %s756_s27 = smov 0   ;;  %s807_s0 = inlined_call_operand.vmem [shape: f32[2,4,128], index: 0, kind: input, shape index: {}]   ;;  %s808_s1 = inlined_call_operand.vmem [shape: f32[2,4,128], index: 1, kind: input, shape index: {}]   ;;  %s809_s2 = inlined_call_operand.vmem [shape: f32[8,4], index: 2, kind: input, shape index: {}]   ;;  %s810_s3 = inlined_call_operand.vmem [shape: f32[8,4], index: 3, kind: input, shape index: {}]   ;;  %s811_s4 = inlined_call_operand.vmem [shape: f32[8,1], index: 4, kind: input, shape index: {}]   ;;  %s812_s5 = inlined_call_operand.vmem [shape: f32[8,1], index: 5, kind: input, shape index: {}]   ;;  %s813_s6 = inlined_call_operand.<no memory space> [shape: f32[1,1], index: 6, kind: input, shape index: {}]   ;;  %s814_s7 = inlined_call_operand.vmem [shape: f32[2,4,128], index: 7, kind: output, shape index: {}]  }
   0x1   :  { %v12_v0 = vstv %s813_s6  ;;  %s758_s28 = smov 0  }
   0x2   :  { %13 = vst [vmem:[#allocation2] sm:$0x1] %v12_v0 }
   0x3 LB: > { %s31_s6 = sadd.s32 1, %s702_s27  ;;  %p626_p0 = scmp.ge.s32.totalorder %s706_s28, 1  ;;  %s706_s28 = sphi %s758_s28, %s19_s28   ;;  %s702_s27 = sphi %s756_s27, %s816_s27   ;;  %s698_s26 = sphi %s754_s26, %s815_s26  }
   0x4   : > { %p33_p1 = scmp.ge.s32.totalorder %s31_s6, 2  ;;  %p271_p2 = scmp.lt.s32.totalorder %s706_s28, 3 }
   0x6   : > { %s818_s6 = smov (%p33_p1, %s31_s6), 0  ;;  %p272_p3 = pnand %p626_p0, %p271_p2 }
   0x7   : > { %p314_p4 = scmp.lt.s32.totalorder (!%p272_p3), %s698_s26, 1  ;;  %v708_v1 = vmov (!%p272_p3), 0.0   ;;  %v493_v2 = vld [vmem:[%s811_s4] sm:$0xff] (!%p272_p3)  ;;  %vm709_vm0 = vmmov (!%p272_p3), 0   ;;  %v710_v4 = vmov (!%p272_p3), 0   ;;  %vm343_vm1 = vcmask (!%p272_p3), 1043456  }
   0x8   : > { %275 = sbr.rel (%p272_p3) target bundleno = 284 (0x11c), region = 48  ;;  %641 = vmatprep.subr.mxu0 (!%p272_p3), %v708_v1  ;;  %646 = vmatprep.subr.mxu1 (!%p272_p3), %v708_v1  ;;  %v337_v5 = vld [vmem:[%s810_s3] sm:$0xff] (!%p272_p3)  ;;  %vm339_vm2 = vcmask (!%p272_p3), 31744   ;;  %v520_v18 = vlaneseq (!%p272_p3) }
   0x9   : > { %643 = vmatprep.mubr.msk.f32.mxu0 (!%p272_p3), %vm709_vm0, %v708_v1  ;;  %648 = vmatprep.mubr.msk.f32.mxu1 (!%p272_p3), %vm709_vm0, %v708_v1  ;;  %v514_v3 = vld [vmem:[#allocation2] sm:$0x1] (!%p272_p3) }
   0xa   : > { %678 = vset.pattern.permute.xlu0 (!%p272_p3), %v710_v4  ;;  %679 = vset.pattern.permute.xlu1 (!%p272_p3), %v710_v4  ;;  %v335_v7 = vld [vmem:[%s809_s2] sm:$0xff] (!%p272_p3)  ;;  %v521_v22 = vshrl.u32 (!%p272_p3), %v520_v18, 7 }
   0xb   : > { %496 = vperm.xlu0 (!%p272_p3), %678, %v493_v2   ;;  %517 = vperm.xlu1 (!%p272_p3), %679, %v514_v3   ;;  %v501_v8 = vld [vmem:[%s812_s5] sm:$0xff] (!%p272_p3) }
   0xc   : > { %v522_v25 = vsub.s32 (!%p272_p3), 0, %v521_v22 }
   0xf   : > { %s820_s26 = smov (!%p314_p4, %s698_s26), 1  ;;  %504 = vperm.xlu0 %678, %v501_v8  }
  0x10   : > { %s775_s8 = sshll.u32 %s820_s26, 2 }
  0x11   : > { %s327_s11 = scalar_lea.vmem %s808_s1, %s775_s8  ;;  %s320_s16 = scalar_lea.vmem %s807_s0, %s775_s8 }
  0x12   : > { %v338_v6 = vld [vmem:[%s327_s11] sm:$0xf]  ;;  %s334_s23 = scalar_lea.vmem %s814_s7, %s775_s8 }
  0x13   : > { %642 = vmatpush3.msk.msra.mxu0 %vm343_vm1, %v338_v6  ;;  %v336_v9 = vld [vmem:[%s320_s16] sm:$0xf] }
  0x14   : > { %647 = vmatpush3.msk.msra.mxu1 %vm343_vm1, %v336_v9  ;;  %644 = vmatmul.mubr.msk.f32.vlgmr.msra.gmra.mrb[0].mxu0 %vm339_vm2, %v337_v5 }
  0x15   : > { %649 = vmatmul.mubr.msk.f32.vlgmr.msra.gmra.mrb[0].mxu1 %vm339_vm2, %v335_v7 }
  0x8a   : > { %v497_v10 = vpop.permute.xlu0 %496  ;;  %v518_v26 = vpop.permute.xlu1 %517 }
  0x8b   : > { %v523_v29 = vrot.slane %v518_v26, %v522_v25 }
  0x8e   : > { %v505_v19 = vpop.permute.xlu0 %504 }
  0xe7   : > { %v413_v11 = vpop.f32.mrb[0].mxu0 }
  0xe8   : > { %v489_v12 = vpop.f32.mrb[0].mxu1  ;;  %v645_v13 = vpop.f32.mrb[1].mxu0 }
  0xe9   : > { %v490_v14 = vadd.f32 %v489_v12, %v413_v11  ;;  %v650_v15 = vpop.f32.mrb[1].mxu1 }
  0xeb   : > { %v499_v16 = vadd.f32 %v497_v10, %v490_v14 }
  0xed   : > { %v500_v17 = vmax.f32 %v499_v16, 0.0 }
  0xef   : > { %v507_v20 = vmul.f32 %v505_v19, %v500_v17 }
  0xf1   : > { %v508_v21 = vrot.slane %v507_v20, 4 }
  0xf3   : > { %v509_v23 = vadd.f32 %v508_v21, %v507_v20 }
  0xf5   : > { %v510_v24 = vrot.slane %v509_v23, 2 }
  0xf7   : > { %v511_v27 = vadd.f32 %v510_v24, %v509_v23 }
  0xf9   : > { %v512_v28 = vrot.slane %v511_v27, 1 }
  0xfb   : > { %v513_v30 = vadd.f32 %v512_v28, %v511_v27 }
  0xfd   : > { %v524_v31 = vadd.f32 %v523_v29, %v513_v30 }
  0xff   : > { %v634_v32 = vmul.f32 -1.442695, %v524_v31 }
 0x101   : > { %680 = vpow2.f32 %v634_v32 }
 0x10b   : > { %v681_v33 = vpop.eup %680 }
 0x10c   : > { %v528_v34 = vadd.f32 1.0, %v681_v33 }
 0x10e   : > { %682 = vrcp.f32 %v528_v34 }
 0x118   : > { %v683_v35 = vpop.eup %682 }
 0x119   : > { %v531_v36 = vmul.f32 %v683_v35, %v338_v6 }
 0x11b   : > { %532 = vst [vmem:[%s334_s23] sm:$0xf] %v531_v36 }
 0x11c PF: > { %s19_s28 = sadd.s32 1, %s706_s28   ;;  %s815_s26 = smov %s702_s27 }
 0x11d   : > { %p16_p5 = scmp.ge.s32.totalorder %s19_s28, 4   ;;  %s816_s27 = smov %s818_s6 }
 0x11f   :  { %18 = sbr.rel (!%p16_p5) target bundleno = 3 (0x3), region = 81 }

</bundles_post_ra>
